<compile_context>
chip_gen: v7x
topology: tpu7x:2x2x1
jax: 0.10.0
libtpu: 0.0.40
codegen_flags: <defaults>
</compile_context>

<pallas_src>
import jax
import jax.numpy as jnp
from jax.experimental import pallas as pl
from jax.experimental.pallas import tpu as pltpu

EPS = 1e-5
CHANNELS = [(3, 64), (64, 64), (64, 64), (64, 128), (128, 1024)]
TN_MAX = 512  # point-axis tile: (TN,1024) f32 intermediate = 2 MiB; safe on v5e/v6e/v7x


def _pointnet_feat_kernel(x_ref, w1, b1, w2, b2, w3, b3, w4, b4, w5, b5,
                          o_ref, acc_ref):
    nt = pl.program_id(1)

    @pl.when(nt == 0)
    def _():
        acc_ref[...] = jnp.full(acc_ref.shape, -jnp.inf, jnp.float32)

    # x_ref block: (1, 3, TN).  Conv1d(k=1) == per-point matmul over channels.
    # Contract the 3-channel (sublane) axis of the (3, TN) tile against dim 0
    # of w1 (transposed-LHS contraction) -> (TN, 64), points on sublanes.
    x = x_ref[0].astype(jnp.bfloat16)                                # (3, TN)
    h = jax.lax.dot_general(x, w1[...],
                            dimension_numbers=(((0,), (0,)), ((), ())),
                            preferred_element_type=jnp.float32)      # (TN, 64)
    h = jnp.maximum(h + b1[...], 0.0)

    def _layer(h, w_ref, b_ref):
        y = jnp.dot(h.astype(jnp.bfloat16), w_ref[...],
                    preferred_element_type=jnp.float32)
        return jnp.maximum(y + b_ref[...], 0.0)

    h = _layer(h, w2, b2)
    h = _layer(h, w3, b3)
    h = _layer(h, w4, b4)

    # Layer 5: bias-add + ReLU commute with the per-channel max over points
    # (max_n relu(h_n + b) == relu(max_n h_n + b)), so they are applied once on
    # the (1, 1024) row in the finalize step instead of per point.
    h5 = jnp.dot(h.astype(jnp.bfloat16), w5[...],
                 preferred_element_type=jnp.float32)                 # (TN, 1024)
    acc_ref[...] = jnp.maximum(acc_ref[...], jnp.max(h5, axis=0, keepdims=True))

    @pl.when(nt == pl.num_programs(1) - 1)
    def _():
        o_ref[0] = jnp.maximum(acc_ref[...] + b5[...], 0.0)


def _fold_bn(w_conv, b_conv, gamma, beta, rmean, rvar):
    """Fold Conv1d(k=1)+BatchNorm1d (eval) into one [Cin,Cout] matmul + bias.

    Fold is computed in f32; the weight is cast to bf16 for the MXU, the bias
    stays f32 for the epilogue.
    """
    scale = gamma / jnp.sqrt(rvar + EPS)                             # [Cout]
    w = (w_conv * scale[:, None]).T                                  # [Cin, Cout]
    b = (b_conv - rmean) * scale + beta                              # [Cout]
    return w.astype(jnp.bfloat16), b.reshape(1, -1).astype(jnp.float32)


def _vmem_limit_bytes(tn, folded_params):
    w_bytes = sum(int(w.size) * w.dtype.itemsize + int(b.size) * b.dtype.itemsize
                  for (w, b) in folded_params)
    x_tile = tn * 3 * 4
    acts = tn * (64 + 64 + 64 + 128 + 1024) * 6    # f32 value + bf16 matmul copy
    est = 2 * (w_bytes + x_tile) + acts + 1024 * 4
    return int(min(max(2 * est, 16 << 20), 40 << 20))


def pointnet_feat_forward(x_bcn, folded_params):
    """x_bcn: [B, 3, N] float32 (channels-first tensor fed to the conv stack).

    Returns the global feature [B, 1024].
    """
    B, C, N = x_bcn.shape
    assert C == 3, C

    if N <= TN_MAX:
        tn, n_pad = N, N                      # single full-extent N tile
    else:
        tn = TN_MAX
        n_pad = -(-N // tn) * tn

    # Pad the point axis by replicating the last point; duplicated points leave
    # the global max unchanged, so the padded tail never needs masking.
    x = x_bcn if n_pad == N else jnp.pad(
        x_bcn, ((0, 0), (0, 0), (0, n_pad - N)), mode="edge")

    flat_params = []
    in_specs = [pl.BlockSpec((1, C, tn), lambda b, n: (b, 0, n))]
    for (w, bias) in folded_params:
        flat_params.extend([w, bias])
        in_specs.append(pl.BlockSpec(w.shape, lambda b, n: (0, 0)))
        in_specs.append(pl.BlockSpec(bias.shape, lambda b, n: (0, 0)))

    out = pl.pallas_call(
        _pointnet_feat_kernel,
        out_shape=jax.ShapeDtypeStruct((B, 1, 1024), jnp.float32),
        grid_spec=pltpu.PrefetchScalarGridSpec(
            num_scalar_prefetch=0,
            grid=(B, n_pad // tn),
            in_specs=in_specs,
            out_specs=pl.BlockSpec((1, 1, 1024), lambda b, n: (b, 0, 0)),
            scratch_shapes=[pltpu.VMEM((1, 1024), jnp.float32)],
        ),
        compiler_params=pltpu.CompilerParams(
            dimension_semantics=("parallel", "arbitrary"),
            vmem_limit_bytes=_vmem_limit_bytes(tn, folded_params),
        ),
    )(x, *flat_params)
    return out[:, 0, :]                                              # [B, 1024]


def _init_params(key):
    """Deterministic synthetic params for conv1..conv5 (Conv1d(k=1) + BatchNorm1d)."""
    raw, folded = [], []
    for (cin, cout) in CHANNELS:
        key, k1, k2, k3, k4, k5, k6 = jax.random.split(key, 7)
        w_conv = 0.1 * jax.random.normal(k1, (cout, cin), jnp.float32)
        b_conv = 0.1 * jax.random.normal(k2, (cout,), jnp.float32)
        gamma = 0.5 + jax.random.uniform(k3, (cout,), jnp.float32)
        beta = 0.1 * jax.random.normal(k4, (cout,), jnp.float32)
        rmean = 0.1 * jax.random.normal(k5, (cout,), jnp.float32)
        rvar = 0.5 + jax.random.uniform(k6, (cout,), jnp.float32)
        raw.append((w_conv, b_conv, gamma, beta, rmean, rvar))
        folded.append(_fold_bn(w_conv, b_conv, gamma, beta, rmean, rvar))
    return raw, folded


def _reference_forward(x_bcn, raw_params):
    """Pure-JAX f32 reference of the PyTorch forward (NCW, BN in eval mode)."""
    h = x_bcn
    for (w_conv, b_conv, gamma, beta, rmean, rvar) in raw_params:
        h = jnp.einsum("oc,bcn->bon", w_conv, h) + b_conv[None, :, None]
        h = (h - rmean[None, :, None]) * (gamma / jnp.sqrt(rvar + EPS))[None, :, None] \
            + beta[None, :, None]
        h = jnp.maximum(h, 0.0)
    return jnp.max(h, axis=2)                                        # [B, 1024]


if __name__ == "__main__":
    key = jax.random.PRNGKey(0)
    key, kx_small, kx_tiled = jax.random.split(key, 3)
    raw_params, folded_params = _init_params(key)

    # Small single-tile case, plus a case exercising the tiled / edge-padded
    # path (N=640 -> two tiles of 512 with a replicated tail).
    for (B, N, kx) in [(2, 16, kx_small), (2, 640, kx_tiled)]:
        # conv1 is Conv1d(3, 64, 1), so the conv stack consumes channels-first [B, 3, N].
        pointcloud = jax.random.normal(kx, (B, 3, N), jnp.float32)

        out = jax.block_until_ready(pointnet_feat_forward(pointcloud, folded_params))
        ref = _reference_forward(pointcloud, raw_params)

        assert out.shape == (B, 1024), out.shape
        # bf16 matmul operands vs f32 reference -> loosened tolerance.
        assert jnp.allclose(out, ref, rtol=3e-2, atol=3e-2), \
            float(jnp.max(jnp.abs(out - ref)))

    print("KERNEL_OK")
</pallas_src>

<mosaic_0001>
module attributes {stable_mosaic.version = 11 : i64} {
  func.func @_pointnet_feat_kernel(%arg0: i32, %arg1: i32, %arg2: memref<1x3x16xf32, #tpu.memory_space<vmem>>, %arg3: memref<3x64xbf16, #tpu.memory_space<vmem>>, %arg4: memref<1x64xf32, #tpu.memory_space<vmem>>, %arg5: memref<64x64xbf16, #tpu.memory_space<vmem>>, %arg6: memref<1x64xf32, #tpu.memory_space<vmem>>, %arg7: memref<64x64xbf16, #tpu.memory_space<vmem>>, %arg8: memref<1x64xf32, #tpu.memory_space<vmem>>, %arg9: memref<64x128xbf16, #tpu.memory_space<vmem>>, %arg10: memref<1x128xf32, #tpu.memory_space<vmem>>, %arg11: memref<128x1024xbf16, #tpu.memory_space<vmem>>, %arg12: memref<1x1024xf32, #tpu.memory_space<vmem>>, %arg13: memref<1x1x1024xf32, #tpu.memory_space<vmem>>, %arg14: memref<1x1024xf32, #tpu.memory_space<vmem>>) attributes {dimension_semantics = [#tpu.dimension_semantics<parallel>, #tpu.dimension_semantics<arbitrary>], iteration_bounds = array<i64: 2, 1>, scalar_prefetch = 0 : i64, scratch_operands = 1 : i64, tpu.core_type = #tpu.core_type<tc>, window_params = [{transform_indices = @transform_0, window_bounds = array<i64: 1, 3, 16>}, {pipeline_mode = #tpu.pipeline_mode<synchronous>, transform_indices = @transform_1, window_bounds = array<i64: 3, 64>}, {pipeline_mode = #tpu.pipeline_mode<synchronous>, transform_indices = @transform_2, window_bounds = array<i64: 1, 64>}, {pipeline_mode = #tpu.pipeline_mode<synchronous>, transform_indices = @transform_3, window_bounds = array<i64: 64, 64>}, {pipeline_mode = #tpu.pipeline_mode<synchronous>, transform_indices = @transform_4, window_bounds = array<i64: 1, 64>}, {pipeline_mode = #tpu.pipeline_mode<synchronous>, transform_indices = @transform_5, window_bounds = array<i64: 64, 64>}, {pipeline_mode = #tpu.pipeline_mode<synchronous>, transform_indices = @transform_6, window_bounds = array<i64: 1, 64>}, {pipeline_mode = #tpu.pipeline_mode<synchronous>, transform_indices = @transform_7, window_bounds = array<i64: 64, 128>}, {pipeline_mode = #tpu.pipeline_mode<synchronous>, transform_indices = @transform_8, window_bounds = array<i64: 1, 128>}, {pipeline_mode = #tpu.pipeline_mode<synchronous>, transform_indices = @transform_9, window_bounds = array<i64: 128, 1024>}, {pipeline_mode = #tpu.pipeline_mode<synchronous>, transform_indices = @transform_10, window_bounds = array<i64: 1, 1024>}, {transform_indices = @transform_11, window_bounds = array<i64: 1, 1, 1024>}]} {
    %c0_i32 = arith.constant 0 : i32
    %0 = arith.cmpi eq, %arg1, %c0_i32 : i32
    %1 = arith.extui %0 : i1 to i32
    %c0_i32_0 = arith.constant 0 : i32
    %2 = arith.cmpi ne, %1, %c0_i32_0 : i32
    scf.if %2 {
      %cst_36 = arith.constant 0xFF800000 : f32
      %48 = vector.broadcast %cst_36 : f32 to vector<1x1024xf32>
      %c0_37 = arith.constant 0 : index
      %c0_38 = arith.constant 0 : index
      %49 = vector.load %arg14[%c0_37, %c0_38] : memref<1x1024xf32, #tpu.memory_space<vmem>>, vector<1x1024xf32>
      tpu.vector_store %arg14[%c0_37, %c0_38], %48 {strides = array<i32>} : memref<1x1024xf32, #tpu.memory_space<vmem>>, vector<1x1024xf32>,
    } else {
    }
    %c0 = arith.constant 0 : index
    %c0_1 = arith.constant 0 : index
    %c0_2 = arith.constant 0 : index
    %3 = vector.load %arg2[%c0, %c0_1, %c0_2] : memref<1x3x16xf32, #tpu.memory_space<vmem>>, vector<1x3x16xf32>
    %4 = vector.shape_cast %3 : vector<1x3x16xf32> to vector<3x16xf32>
    %5 = arith.truncf %4 : vector<3x16xf32> to vector<3x16xbf16>
    %c0_3 = arith.constant 0 : index
    %c0_4 = arith.constant 0 : index
    %6 = vector.load %arg3[%c0_3, %c0_4] : memref<3x64xbf16, #tpu.memory_space<vmem>>, vector<3x64xbf16>
    %cst = arith.constant dense<0.000000e+00> : vector<16x64xf32>
    %7 = tpu.matmul %5, %6, %cst {dimension_numbers = #tpu.dot_dimension_numbers<[0], [0], [1], [1], [0, 1, 1, 1], [], []>} : vector<3x16xbf16>, vector<3x64xbf16>, vector<16x64xf32> -> vector<16x64xf32>
    %c0_5 = arith.constant 0 : index
    %c0_6 = arith.constant 0 : index
    %8 = vector.load %arg4[%c0_5, %c0_6] : memref<1x64xf32, #tpu.memory_space<vmem>>, vector<1x64xf32>
    %9 = vector.broadcast %8 : vector<1x64xf32> to vector<16x64xf32>
    %10 = arith.addf %7, %9 : vector<16x64xf32>
    %cst_7 = arith.constant 0.000000e+00 : f32
    %11 = vector.broadcast %cst_7 : f32 to vector<16x64xf32>
    %12 = arith.maximumf %10, %11 : vector<16x64xf32>
    %13 = arith.truncf %12 : vector<16x64xf32> to vector<16x64xbf16>
    %c0_8 = arith.constant 0 : index
    %c0_9 = arith.constant 0 : index
    %14 = vector.load %arg5[%c0_8, %c0_9] : memref<64x64xbf16, #tpu.memory_space<vmem>>, vector<64x64xbf16>
    %cst_10 = arith.constant dense<0.000000e+00> : vector<16x64xf32>
    %15 = tpu.matmul %13, %14, %cst_10 {dimension_numbers = #tpu.dot_dimension_numbers<[1], [0], [0], [1], [0, 0, 1, 1], [], []>} : vector<16x64xbf16>, vector<64x64xbf16>, vector<16x64xf32> -> vector<16x64xf32>
    %c0_11 = arith.constant 0 : index
    %c0_12 = arith.constant 0 : index
    %16 = vector.load %arg6[%c0_11, %c0_12] : memref<1x64xf32, #tpu.memory_space<vmem>>, vector<1x64xf32>
    %17 = vector.broadcast %16 : vector<1x64xf32> to vector<16x64xf32>
    %18 = arith.addf %15, %17 : vector<16x64xf32>
    %cst_13 = arith.constant 0.000000e+00 : f32
    %19 = vector.broadcast %cst_13 : f32 to vector<16x64xf32>
    %20 = arith.maximumf %18, %19 : vector<16x64xf32>
    %21 = arith.truncf %20 : vector<16x64xf32> to vector<16x64xbf16>
    %c0_14 = arith.constant 0 : index
    %c0_15 = arith.constant 0 : index
    %22 = vector.load %arg7[%c0_14, %c0_15] : memref<64x64xbf16, #tpu.memory_space<vmem>>, vector<64x64xbf16>
    %cst_16 = arith.constant dense<0.000000e+00> : vector<16x64xf32>
    %23 = tpu.matmul %21, %22, %cst_16 {dimension_numbers = #tpu.dot_dimension_numbers<[1], [0], [0], [1], [0, 0, 1, 1], [], []>} : vector<16x64xbf16>, vector<64x64xbf16>, vector<16x64xf32> -> vector<16x64xf32>
    %c0_17 = arith.constant 0 : index
    %c0_18 = arith.constant 0 : index
    %24 = vector.load %arg8[%c0_17, %c0_18] : memref<1x64xf32, #tpu.memory_space<vmem>>, vector<1x64xf32>
    %25 = vector.broadcast %24 : vector<1x64xf32> to vector<16x64xf32>
    %26 = arith.addf %23, %25 : vector<16x64xf32>
    %cst_19 = arith.constant 0.000000e+00 : f32
    %27 = vector.broadcast %cst_19 : f32 to vector<16x64xf32>
    %28 = arith.maximumf %26, %27 : vector<16x64xf32>
    %29 = arith.truncf %28 : vector<16x64xf32> to vector<16x64xbf16>
    %c0_20 = arith.constant 0 : index
    %c0_21 = arith.constant 0 : index
    %30 = vector.load %arg9[%c0_20, %c0_21] : memref<64x128xbf16, #tpu.memory_space<vmem>>, vector<64x128xbf16>
    %cst_22 = arith.constant dense<0.000000e+00> : vector<16x128xf32>
    %31 = tpu.matmul %29, %30, %cst_22 {dimension_numbers = #tpu.dot_dimension_numbers<[1], [0], [0], [1], [0, 0, 1, 1], [], []>} : vector<16x64xbf16>, vector<64x128xbf16>, vector<16x128xf32> -> vector<16x128xf32>
    %c0_23 = arith.constant 0 : index
    %c0_24 = arith.constant 0 : index
    %32 = vector.load %arg10[%c0_23, %c0_24] : memref<1x128xf32, #tpu.memory_space<vmem>>, vector<1x128xf32>
    %33 = vector.broadcast %32 : vector<1x128xf32> to vector<16x128xf32>
    %34 = arith.addf %31, %33 : vector<16x128xf32>
    %cst_25 = arith.constant 0.000000e+00 : f32
    %35 = vector.broadcast %cst_25 : f32 to vector<16x128xf32>
    %36 = arith.maximumf %34, %35 : vector<16x128xf32>
    %37 = arith.truncf %36 : vector<16x128xf32> to vector<16x128xbf16>
    %c0_26 = arith.constant 0 : index
    %c0_27 = arith.constant 0 : index
    %38 = vector.load %arg11[%c0_26, %c0_27] : memref<128x1024xbf16, #tpu.memory_space<vmem>>, vector<128x1024xbf16>
    %cst_28 = arith.constant dense<0.000000e+00> : vector<16x1024xf32>
    %39 = tpu.matmul %37, %38, %cst_28 {dimension_numbers = #tpu.dot_dimension_numbers<[1], [0], [0], [1], [0, 0, 1, 1], [], []>} : vector<16x128xbf16>, vector<128x1024xbf16>, vector<16x1024xf32> -> vector<16x1024xf32>
    %c0_29 = arith.constant 0 : index
    %c0_30 = arith.constant 0 : index
    %40 = vector.load %arg14[%c0_29, %c0_30] : memref<1x1024xf32, #tpu.memory_space<vmem>>, vector<1x1024xf32>
    %cst_31 = arith.constant dense<0xFF800000> : vector<1024xf32>
    %41 = vector.multi_reduction <maximumf>, %39, %cst_31 [0] : vector<16x1024xf32> to vector<1024xf32>
    %42 = vector.shape_cast %41 : vector<1024xf32> to vector<1x1024xf32>
    %43 = arith.maximumf %40, %42 : vector<1x1024xf32>
    %c0_32 = arith.constant 0 : index
    %c0_33 = arith.constant 0 : index
    %44 = vector.load %arg14[%c0_32, %c0_33] : memref<1x1024xf32, #tpu.memory_space<vmem>>, vector<1x1024xf32>
    tpu.vector_store %arg14[%c0_32, %c0_33], %43 {strides = array<i32>} : memref<1x1024xf32, #tpu.memory_space<vmem>>, vector<1x1024xf32>,
    %c0_i32_34 = arith.constant 0 : i32
    %45 = arith.cmpi eq, %arg1, %c0_i32_34 : i32
    %46 = arith.extui %45 : i1 to i32
    %c0_i32_35 = arith.constant 0 : i32
    %47 = arith.cmpi ne, %46, %c0_i32_35 : i32
    scf.if %47 {
      %c0_36 = arith.constant 0 : index
      %c0_37 = arith.constant 0 : index
      %48 = vector.load %arg14[%c0_36, %c0_37] : memref<1x1024xf32, #tpu.memory_space<vmem>>, vector<1x1024xf32>
      %c0_38 = arith.constant 0 : index
      %c0_39 = arith.constant 0 : index
      %49 = vector.load %arg12[%c0_38, %c0_39] : memref<1x1024xf32, #tpu.memory_space<vmem>>, vector<1x1024xf32>
      %50 = arith.addf %48, %49 : vector<1x1024xf32>
      %cst_40 = arith.constant 0.000000e+00 : f32
      %51 = vector.broadcast %cst_40 : f32 to vector<1x1024xf32>
      %52 = arith.maximumf %50, %51 : vector<1x1024xf32>
      %c0_41 = arith.constant 0 : index
      %c0_42 = arith.constant 0 : index
      %c0_43 = arith.constant 0 : index
      %53 = vector.load %arg13[%c0_41, %c0_42, %c0_43] : memref<1x1x1024xf32, #tpu.memory_space<vmem>>, vector<1x1x1024xf32>
      %54 = vector.shape_cast %53 : vector<1x1x1024xf32> to vector<1x1024xf32>
      %55 = vector.shape_cast %52 : vector<1x1024xf32> to vector<1x1x1024xf32>
      tpu.vector_store %arg13[%c0_41, %c0_42, %c0_43], %55 {strides = array<i32>} : memref<1x1x1024xf32, #tpu.memory_space<vmem>>, vector<1x1x1024xf32>,
    } else {
    }
    return
  }
  func.func @transform_0(%arg0: i32, %arg1: i32) -> (i32, i32, i32) {
    %c0_i32 = arith.constant 0 : i32
    %c0_i32_0 = arith.constant 0 : i32
    return %arg0, %c0_i32, %arg1 : i32, i32, i32
  }
  func.func @transform_1(%arg0: i32, %arg1: i32) -> (i32, i32) {
    %c0_i32 = arith.constant 0 : i32
    %c0_i32_0 = arith.constant 0 : i32
    %c0_i32_1 = arith.constant 0 : i32
    return %c0_i32, %c0_i32_0 : i32, i32
  }
  func.func @transform_2(%arg0: i32, %arg1: i32) -> (i32, i32) {
    %c0_i32 = arith.constant 0 : i32
    %c0_i32_0 = arith.constant 0 : i32
    %c0_i32_1 = arith.constant 0 : i32
    return %c0_i32, %c0_i32_0 : i32, i32
  }
  func.func @transform_3(%arg0: i32, %arg1: i32) -> (i32, i32) {
    %c0_i32 = arith.constant 0 : i32
    %c0_i32_0 = arith.constant 0 : i32
    %c0_i32_1 = arith.constant 0 : i32
    return %c0_i32, %c0_i32_0 : i32, i32
  }
  func.func @transform_4(%arg0: i32, %arg1: i32) -> (i32, i32) {
    %c0_i32 = arith.constant 0 : i32
    %c0_i32_0 = arith.constant 0 : i32
    %c0_i32_1 = arith.constant 0 : i32
    return %c0_i32, %c0_i32_0 : i32, i32
  }
  func.func @transform_5(%arg0: i32, %arg1: i32) -> (i32, i32) {
    %c0_i32 = arith.constant 0 : i32
    %c0_i32_0 = arith.constant 0 : i32
    %c0_i32_1 = arith.constant 0 : i32
    return %c0_i32, %c0_i32_0 : i32, i32
  }
  func.func @transform_6(%arg0: i32, %arg1: i32) -> (i32, i32) {
    %c0_i32 = arith.constant 0 : i32
    %c0_i32_0 = arith.constant 0 : i32
    %c0_i32_1 = arith.constant 0 : i32
    return %c0_i32, %c0_i32_0 : i32, i32
  }
  func.func @transform_7(%arg0: i32, %arg1: i32) -> (i32, i32) {
    %c0_i32 = arith.constant 0 : i32
    %c0_i32_0 = arith.constant 0 : i32
    %c0_i32_1 = arith.constant 0 : i32
    return %c0_i32, %c0_i32_0 : i32, i32
  }
  func.func @transform_8(%arg0: i32, %arg1: i32) -> (i32, i32) {
    %c0_i32 = arith.constant 0 : i32
    %c0_i32_0 = arith.constant 0 : i32
    %c0_i32_1 = arith.constant 0 : i32
    return %c0_i32, %c0_i32_0 : i32, i32
  }
  func.func @transform_9(%arg0: i32, %arg1: i32) -> (i32, i32) {
    %c0_i32 = arith.constant 0 : i32
    %c0_i32_0 = arith.constant 0 : i32
    %c0_i32_1 = arith.constant 0 : i32
    return %c0_i32, %c0_i32_0 : i32, i32
  }
  func.func @transform_10(%arg0: i32, %arg1: i32) -> (i32, i32) {
    %c0_i32 = arith.constant 0 : i32
    %c0_i32_0 = arith.constant 0 : i32
    %c0_i32_1 = arith.constant 0 : i32
    return %c0_i32, %c0_i32_0 : i32, i32
  }
  func.func @transform_11(%arg0: i32, %arg1: i32) -> (i32, i32, i32) {
    %c0_i32 = arith.constant 0 : i32
    %c0_i32_0 = arith.constant 0 : i32
    %c0_i32_1 = arith.constant 0 : i32
    return %arg0, %c0_i32, %c0_i32_0 : i32, i32, i32
  }
}

</mosaic_0001>

<bundles_post_ra>
// kernel: tpu_custom_call.1
= control target key start
LH: loop header
LB: loop body
LE: loop exit
PB: predicated region body
PF: predicated region fallthrough
CT: control target
= control target key end

     0   :  { %s2720_s0 = inlined_call_operand.vmem [shape: f32[2,3,16], index: 0, kind: input, shape index: {}]   ;;  %s2721_s1 = inlined_call_operand.hbm [shape: bf16[3,64], index: 1, kind: input, shape index: {}]   ;;  %s2722_s2 = inlined_call_operand.hbm [shape: f32[1,64], index: 2, kind: input, shape index: {}]   ;;  %s2723_s3 = inlined_call_operand.hbm [shape: bf16[64,64], index: 3, kind: input, shape index: {}]   ;;  %s2724_s4 = inlined_call_operand.hbm [shape: f32[1,64], index: 4, kind: input, shape index: {}]   ;;  %s2725_s5 = inlined_call_operand.vmem [shape: bf16[64,64], index: 5, kind: input, shape index: {}]   ;;  %s2726_s6 = inlined_call_operand.hbm [shape: f32[1,64], index: 6, kind: input, shape index: {}]   ;;  %s2727_s7 = inlined_call_operand.hbm [shape: bf16[64,128], index: 7, kind: input, shape index: {}]   ;;  %s2728_s8 = inlined_call_operand.vmem [shape: f32[1,128], index: 8, kind: input, shape index: {}]   ;;  %s2729_s9 = inlined_call_operand.hbm [shape: bf16[128,1024], index: 9, kind: input, shape index: {}]   ;;  %s2730_s10 = inlined_call_operand.vmem [shape: f32[1,1024], index: 10, kind: input, shape index: {}]   ;;  %s2731_s11 = inlined_call_operand.hbm [shape: f32[2,1,1024], index: 11, kind: output, shape index: {}]  }
   0x1   :  { %2743 = sst [smem:[#allocation28_spill]] %s2722_s2 }
   0x2   :  { %2744 = sst [smem:[#allocation29_spill]] %s2724_s4 }
   0x3   :  { %16 = vsyncpa [#allocation4], 0 }
   0x4   :  { %17 = vsyncpa [#allocation7], 0 }
   0x5   :  { %18 = vsyncpa [#allocation10], 0 }
   0x6   :  { %19 = vsyncpa [#allocation13], 0 }
   0x7   :  { %20 = vsyncpa [#allocation5], 0 }
   0x8   :  { %22 = vsyncpa [#allocation5 + $0x1], 0  ;;  %s2366_s17 = smov 0   ;;  %s2368_s18 = smov 0  }
   0x9   :  { %s2370_s19 = smov 0   ;;  %s2372_s20 = smov 0  }
   0xa   :  { %s2374_s21 = smov 0   ;;  %s2376_s22 = smov 0  }
   0xb LB: > { %2745 = sst [smem:[#allocation21_spill]] %s2267_s17  ;;  %s1680_s23 = sadd.s32 4294967295, %s2287_s22   ;;  %s2287_s22 = sphi %s2376_s22, %s28_s22   ;;  %s2283_s21 = sphi %s2374_s21, %s2770_s21   ;;  %s2279_s20 = sphi %s2372_s20, %s2769_s20   ;;  %s2275_s19 = sphi %s2370_s19, %s2768_s19   ;;  %s2271_s18 = sphi %s2368_s18, %s2772_s18   ;;  %s2267_s17 = sphi %s2366_s17, %s2771_s17  }
   0xc   : > { %2746 = sst [smem:[#allocation22_spill]] %s2275_s19  ;;  %s1681_s24 = sadd.s32 4294967294, %s2287_s22  }
   0xd   : > { %2747 = sst [smem:[#allocation23_spill]] %s2283_s21  ;;  %s40_s25 = sadd.s32 1, %s2283_s21 }
   0xe   : > { %2748 = sst [smem:[#allocation24_spill]] %s2287_s22  ;;  %s285_s26 = sadd.s32 1, %s2275_s19 }
   0xf   : > { %p42_p0 = scmp.ge.s32.totalorder %s40_s25, 2  ;;  %p295_p1 = scmp.ne.s32.totalorder %s2275_s19, %s2271_s18 }
  0x10   : > { %p296_p2 = scmp.eq.s32.totalorder %s1680_s23, 1  ;;  %p301_p3 = scmp.ne.s32.totalorder %s2271_s18, %s2267_s17 }
  0x11   : > { %s2774_s25 = smov (%p42_p0, %s40_s25), 0  ;;  %p302_p5 = scmp.eq.s32.totalorder %s1681_s24, 1 }
  0x12   : > { %2749 = sst [smem:[#allocation25_spill]] %s2774_s25  ;;  %p2406_p4 = por %p296_p2, %p295_p1 }
  0x13   : > { %s282_s28 = ssub.s32 %s2283_s21, %s2774_s25  ;;  %p1682_p6 = scmp.ge.s32.totalorder %s2287_s22, 1 }
  0x14   : > { %s2750_s27 = scalar_select %p2406_p4, 1, 0 }
  0x15   : > { %p283_p7 = scmp.eq.s32.totalorder %s282_s28, 0  ;;  %p2413_p8 = por %p302_p5, %p301_p3 }
  0x16   : > { %p309_p9 = scmp.lt.s32.totalorder %s2287_s22, 3  ;;  %p2425_p11 = scmp.eq.s32.totalorder %s1680_s23, 0 }
  0x17   : > { %s2751_s29 = scalar_select %p2413_p8, 1, 0 }
  0x18   : > { %s2419_s30 = scalar_select %p283_p7, %s2275_s19, %s285_s26  }
  0x19   : > { %2752 = sst [smem:[#allocation26_spill]] %s2751_s29  ;;  %p2421_p10 = pnand %p1682_p6, %p309_p9 }
  0x1a   : > { %2753 = sst [smem:[#allocation27_spill]] %s2419_s30  ;;  %s2289_s14 = smov [#allocation6]  }
  0x1b   : > { %s2754_s12 = scalar_select %p2421_p10, 1, 0 }
  0x1c   : > { %s2755_s13 = scalar_select %p2425_p11, 1, 0 }
  0x1d   : > { %p1880_p12 = pneg %p2421_p10  ;;  %s333_s15 = sshll.u32 %s2289_s14, 4  ;;  %s334_s15 = int_to_ptr.vmem [resolvable:$true] %s333_s15 }
  0x1e   : > { %s2290_s16 = smov [#allocation9]   ;;  %s2757_s2 = sld [smem:[#allocation28_spill]] }
  0x1f   : > { %s357_s24 = sshll.u32 %s2290_s16, 4  ;;  %p2433_p13 = pnand %p2425_p11, %p1880_p12  ;;  %s2437_s24 = int_to_ptr.vmem [resolvable:$true] %s357_s24 }
  0x21   : > { %p2447_p1 = pneg %p2433_p13 }
  0x24   : > { %s1997_s25 = scalar_lea.hbm %s2757_s2, 16 }
  0x25   : > { %p1998_p0 = scmp.ne.s32.totalorder %s2757_s2, %s1997_s25  ;;  %p2004_p5 = scmp.lt.u32.totalorder %s1997_s25, %s2757_s2 }
  0x27   : > { %p2000_p2 = pnand %p2447_p1, %p1998_p0 }
  0x29   : > { %p2001_p3 = pneg %p2000_p2 }
  0x2b   : > { %p2006_p6 = pnand %p2004_p5, %p2001_p3 }
  0x2d   : > { %2009 = shalt.err (!%p2006_p6)
}
  0x2e   : > { %s2010_s23 = scalar_lea.vmem %s334_s15, 16  ;;  %s2017_s21 = scalar_lea.vmem %s334_s15, 32 }
  0x2f   : > { %p2011_p7 = scmp.ne.s32.totalorder %s334_s15, %s2010_s23  ;;  %p2018_p8 = scmp.lt.s32.totalorder %s334_s15, %s334_s15 }
  0x30   : > { %p2019_p4 = scmp.lt.s32.totalorder %s2017_s21, %s2010_s23 }
  0x31   : > { %p2013_p9 = pnand %p2011_p7, %p2447_p1 }
  0x32   : > { %p2020_p11 = por %p2019_p4, %p2018_p8 }
  0x33   : > { %p2014_p12 = pneg %p2013_p9 }
  0x35   : > { %p2021_p10 = pnand %p2020_p11, %p2014_p12 }
  0x37   : > { %2024 = shalt.err (!%p2021_p10)
}
  0x38   : > { %1886 = dma.hbm_to_vmem [thread:$0]  (!%p2433_p13), %s2757_s2, 16, %s334_s15, [#allocation7]  }
  0x39   : > { %s2759_s4 = sld [smem:[#allocation29_spill]] }
  0x3f   : > { %s2025_s16 = scalar_lea.hbm %s2759_s4, 16 }
  0x40   : > { %p2026_p0 = scmp.ne.s32.totalorder %s2759_s4, %s2025_s16  ;;  %p2032_p8 = scmp.lt.u32.totalorder %s2025_s16, %s2759_s4 }
  0x42   : > { %p2028_p2 = pnand %p2026_p0, %p2447_p1 }
  0x44   : > { %p2029_p4 = pneg %p2028_p2 }
  0x46   : > { %p2034_p10 = pnand %p2032_p8, %p2029_p4 }
  0x48   : > { %2037 = shalt.err (!%p2034_p10)
}
  0x49   : > { %s2038_s15 = scalar_lea.vmem %s2437_s24, 16  ;;  %s2045_s17 = scalar_lea.vmem %s2437_s24, 32 }
  0x4a   : > { %p2039_p11 = scmp.ne.s32.totalorder %s2437_s24, %s2038_s15  ;;  %p2046_p6 = scmp.lt.s32.totalorder %s2437_s24, %s2437_s24 }
  0x4b   : > { %p2047_p7 = scmp.lt.s32.totalorder %s2045_s17, %s2038_s15 }
  0x4c   : > { %p2041_p3 = pnand %p2039_p11, %p2447_p1 }
  0x4d   : > { %p2048_p9 = por %p2047_p7, %p2046_p6 }
  0x4e   : > { %p2042_p5 = pneg %p2041_p3 }
  0x50   : > { %p2049_p12 = pnand %p2048_p9, %p2042_p5 }
  0x52   : > { %2052 = shalt.err (!%p2049_p12)
}
  0x53   : > { %1892 = dma.hbm_to_vmem [thread:$0]  (!%p2433_p13), %s2759_s4, 16, %s2437_s24, [#allocation10]  }
  0x54   : > { %s2291_s28 = smov [#allocation12]   ;;  %s2053_s23 = scalar_lea.hbm %s2727_s7, 512 }
  0x55   : > { %s381_s19 = sshll.u32 %s2291_s28, 4  ;;  %p2054_p0 = scmp.ne.s32.totalorder %s2727_s7, %s2053_s23  ;;  %s382_s19 = int_to_ptr.vmem [resolvable:$true] %s381_s19 }
  0x56   : > { %p2060_p8 = scmp.lt.u32.totalorder %s2053_s23, %s2727_s7 }
  0x57   : > { %p2056_p2 = pnand %p2054_p0, %p2447_p1 }
  0x59   : > { %p2057_p4 = pneg %p2056_p2 }
  0x5b   : > { %p2062_p10 = pnand %p2060_p8, %p2057_p4 }
  0x5d   : > { %2065 = shalt.err (!%p2062_p10)
}
  0x5e   : > { %s2066_s24 = scalar_lea.vmem %s382_s19, 512  ;;  %p2074_p6 = scmp.lt.s32.totalorder %s382_s19, %s382_s19 }
  0x5f   : > { %p2067_p11 = scmp.ne.s32.totalorder %s382_s19, %s2066_s24  ;;  %p2075_p7 = scmp.lt.s32.totalorder %s2066_s24, %s2066_s24 }
  0x61   : > { %p2069_p3 = pnand %p2067_p11, %p2447_p1  ;;  %p2076_p9 = por %p2075_p7, %p2074_p6 }
  0x63   : > { %p2070_p5 = pneg %p2069_p3 }
  0x65   : > { %p2077_p12 = pnand %p2076_p9, %p2070_p5 }
  0x67   : > { %2080 = shalt.err (!%p2077_p12)
}
  0x68   : > { %s2292_s29 = smov 64   ;;  %s2293_s30 = smov 4  }
  0x69   : > { %1898 = dma.hbm_to_vmem [thread:$0]  (!%p2433_p13), %s2727_s7, 512, %s382_s19, [#allocation13], %s2292_s29, %s2292_s29, %s2293_s30  }
  0x6a   : > { %s2294_s25 = smov [#allocation3]   ;;  %s2295_s23 = smov [#allocation8]  }
  0x6b   : > { %s322_s16 = sshll.u32 %s2294_s25, 4  ;;  %s343_s21 = sshll.u32 %s2295_s23, 4  ;;  %s323_s16 = int_to_ptr.vmem [resolvable:$true] %s322_s16  ;;  %s2508_s21 = int_to_ptr.vmem [resolvable:$true] %s343_s21 }
  0x6c   : > { %s2081_s24 = scalar_lea.hbm %s2721_s1, 32 }
  0x6d   : > { %p2082_p0 = scmp.ne.s32.totalorder %s2721_s1, %s2081_s24  ;;  %p2088_p8 = scmp.lt.u32.totalorder %s2081_s24, %s2721_s1 }
  0x6f   : > { %p2084_p2 = pnand %p2082_p0, %p2447_p1 }
  0x71   : > { %p2085_p4 = pneg %p2084_p2 }
  0x73   : > { %p2090_p10 = pnand %p2088_p8, %p2085_p4 }
  0x75   : > { %2093 = shalt.err (!%p2090_p10)
}
  0x76   : > { %s2094_s28 = scalar_lea.vmem %s323_s16, 32  ;;  %p2102_p6 = scmp.lt.s32.totalorder %s323_s16, %s323_s16 }
  0x77   : > { %p2095_p11 = scmp.ne.s32.totalorder %s323_s16, %s2094_s28  ;;  %p2103_p7 = scmp.lt.s32.totalorder %s2094_s28, %s2094_s28 }
  0x79   : > { %p2097_p3 = pnand %p2095_p11, %p2447_p1  ;;  %p2104_p9 = por %p2103_p7, %p2102_p6 }
  0x7b   : > { %p2098_p5 = pneg %p2097_p3 }
  0x7d   : > { %p2105_p12 = pnand %p2104_p9, %p2098_p5 }
  0x7f   : > { %2108 = shalt.err (!%p2105_p12)
}
  0x80   : > { %1883 = dma.hbm_to_vmem [thread:$0]  (!%p2433_p13), %s2721_s1, 32, %s323_s16, [#allocation4]  }
  0x81   : > { %s2109_s15 = scalar_lea.hbm %s2723_s3, 512 }
  0x82   : > { %p2110_p0 = scmp.ne.s32.totalorder %s2723_s3, %s2109_s15  ;;  %p2116_p8 = scmp.lt.u32.totalorder %s2109_s15, %s2723_s3 }
  0x84   : > { %p2112_p2 = pnand %p2110_p0, %p2447_p1 }
  0x86   : > { %p2113_p4 = pneg %p2112_p2 }
  0x88   : > { %p2118_p10 = pnand %p2116_p8, %p2113_p4 }
  0x8a   : > { %2121 = shalt.err (!%p2118_p10)
}
  0x8b   : > { %s2122_s16 = scalar_lea.vmem %s2508_s21, 512  ;;  %p2130_p6 = scmp.lt.s32.totalorder %s2508_s21, %s2508_s21 }
  0x8c   : > { %p2123_p11 = scmp.ne.s32.totalorder %s2508_s21, %s2122_s16  ;;  %p2131_p7 = scmp.lt.s32.totalorder %s2122_s16, %s2122_s16 }
  0x8e   : > { %p2125_p3 = pnand %p2123_p11, %p2447_p1  ;;  %p2132_p9 = por %p2131_p7, %p2130_p6 }
  0x90   : > { %p2126_p5 = pneg %p2125_p3 }
  0x92   : > { %p2133_p12 = pnand %p2132_p9, %p2126_p5 }
  0x94   : > { %2136 = shalt.err (!%p2133_p12)
}
  0x95   : > { %1889 = dma.hbm_to_vmem [thread:$0]  (!%p2433_p13), %s2723_s3, 512, %s2508_s21, [#allocation7], %s2292_s29, %s2292_s29, %s2293_s30  }
  0x96   : > { %s2296_s22 = smov [#allocation11]   ;;  %s2297_s23 = smov [#allocation14]  }
  0x97   : > { %s371_s25 = sshll.u32 %s2296_s22, 4  ;;  %s397_s15 = sshll.u32 %s2297_s23, 4  ;;  %s372_s25 = int_to_ptr.vmem [resolvable:$true] %s371_s25  ;;  %s2554_s15 = int_to_ptr.vmem [resolvable:$true] %s397_s15 }
  0x98   : > { %s2137_s2 = scalar_lea.hbm %s2726_s6, 16 }
  0x99   : > { %p2138_p0 = scmp.ne.s32.totalorder %s2726_s6, %s2137_s2  ;;  %p2144_p8 = scmp.lt.u32.totalorder %s2137_s2, %s2726_s6 }
  0x9b   : > { %p2140_p2 = pnand %p2138_p0, %p2447_p1 }
  0x9d   : > { %p2141_p4 = pneg %p2140_p2 }
  0x9f   : > { %p2146_p10 = pnand %p2144_p8, %p2141_p4 }
  0xa1   : > { %2149 = shalt.err (!%p2146_p10)
}
  0xa2   : > { %s2150_s30 = scalar_lea.vmem %s372_s25, 16  ;;  %s2157_s21 = scalar_lea.vmem %s372_s25, 32 }
  0xa3   : > { %p2151_p11 = scmp.ne.s32.totalorder %s372_s25, %s2150_s30  ;;  %p2158_p6 = scmp.lt.s32.totalorder %s372_s25, %s372_s25 }
  0xa4   : > { %p2159_p7 = scmp.lt.s32.totalorder %s2157_s21, %s2150_s30 }
  0xa5   : > { %p2153_p3 = pnand %p2151_p11, %p2447_p1 }
  0xa6   : > { %p2160_p9 = por %p2159_p7, %p2158_p6 }
  0xa7   : > { %p2154_p5 = pneg %p2153_p3 }
  0xa9   : > { %p2161_p12 = pnand %p2160_p9, %p2154_p5 }
  0xab   : > { %2164 = shalt.err (!%p2161_p12)
}
  0xac   : > { %1895 = dma.hbm_to_vmem [thread:$0]  (!%p2433_p13), %s2726_s6, 16, %s372_s25, [#allocation10]  }
  0xad   : > { %s2165_s24 = scalar_lea.hbm %s2729_s9, 8192 }
  0xae   : > { %p2166_p0 = scmp.ne.s32.totalorder %s2729_s9, %s2165_s24  ;;  %p2172_p8 = scmp.lt.u32.totalorder %s2165_s24, %s2729_s9 }
  0xb0   : > { %p2168_p2 = pnand %p2166_p0, %p2447_p1 }
  0xb2   : > { %p2169_p4 = pneg %p2168_p2 }
  0xb4   : > { %p2174_p10 = pnand %p2172_p8, %p2169_p4 }
  0xb6   : > { %2177 = shalt.err (!%p2174_p10)
}
  0xb7   : > { %s2178_s25 = scalar_lea.vmem %s2554_s15, 8192  ;;  %p2186_p6 = scmp.lt.s32.totalorder %s2554_s15, %s2554_s15 }
  0xb8   : > { %p2179_p11 = scmp.ne.s32.totalorder %s2554_s15, %s2178_s25  ;;  %p2187_p7 = scmp.lt.s32.totalorder %s2178_s25, %s2178_s25 }
  0xba   : > { %p2181_p3 = pnand %p2179_p11, %p2447_p1  ;;  %p2188_p9 = por %p2187_p7, %p2186_p6 }
  0xbc   : > { %p2182_p5 = pneg %p2181_p3 }
  0xbe   : > { %p2189_p12 = pnand %p2188_p9, %p2182_p5 }
  0xc0   : > { %2192 = shalt.err (!%p2189_p12)
}
  0xc1   : > { %s2298_s29 = smov 512   ;;  %s2299_s30 = smov 32  }
  0xc2   : > { %1901 = dma.hbm_to_vmem [thread:$0]  (!%p2433_p13), %s2729_s9, 8192, %s2554_s15, [#allocation13], %s2298_s29, %s2298_s29, %s2299_s30  }
  0xc3   : > { %p2760_p0 = scmp.ne.s32.totalorder %s2754_s12, 0 }
  0xc4   : > { %p2761_p1 = scmp.ne.s32.totalorder (!%p2760_p0), %s2755_s13, 0 }
  0xc5   : > { %426 = sbr.rel (%p2760_p0) target bundleno = 1492 (0x5d4), region = 64 }
  0xcc   : > { %2246 = dma.done.wait (%p2761_p1), [#allocation4], 32  }
  0xcd   : > { %2248 = vsyncadd (%p2761_p1), [#allocation4], 4294967264 }
  0xce   : > { %2250 = dma.done.wait (%p2761_p1), [#allocation7], 528  }
  0xcf   : > { %2252 = vsyncadd (%p2761_p1), [#allocation7], 4294966768 }
  0xd0   : > { %2254 = dma.done.wait (%p2761_p1), [#allocation10], 32  }
  0xd1   : > { %2256 = vsyncadd (%p2761_p1), [#allocation10], 4294967264 }
  0xd2   : > { %2258 = dma.done.wait (%p2761_p1), [#allocation13], 8704  }
  0xd3   : > { %2260 = vsyncadd (%p2761_p1), [#allocation13], 4294958592  ;;  %p492_p13 = scmp.lt.s32.totalorder %s2279_s20, 1  ;;  %vm535_vm0 = vcmask 1040384   ;;  %v2300_v0 = vmov 0.0   ;;  %vm536_vm1 = vcmask 1041408  }
  0xd4   : > { %1808 = vmatprep.subr.bf16.mxu0 %v2300_v0  ;;  %1814 = vmatprep.subr.bf16.mxu1 %v2300_v0  ;;  %v2301_v1 = vmov 65535   ;;  %vm2302_vm2 = vmmov 0   ;;  %v507_v5 = vld [vmem:[#allocation3] sm:$0x3]  ;;  %v1985_v8 = vld [vmem:[#allocation8] sm:$0xff]   ;;  %v1986_v9 = vld [vmem:[#allocation8 + $0x8] sm:$0xff]  }
  0xd5   : > { %s493_s12 = scalar_select %p492_p13, %s2279_s20, 1  ;;  %v537_v2 = vsel %vm535_vm0, 4294967295, %v2301_v1  ;;  %1810 = vmatprep.mubr.msk.bf16.mxu0 %vm2302_vm2, %v2300_v0  ;;  %1822 = vmatprep.mubr.msk.bf16.mxu1 %vm2302_vm2, %v2300_v0  ;;  %vm531_vm3 = vcmask 23552   ;;  %v1987_v11 = vld [vmem:[#allocation8 + $0x10] sm:$0xff]   ;;  %v1988_v12 = vld [vmem:[#allocation8 + $0x18] sm:$0xff]   ;;  %vm625_vm4 = vcmask 523264  }
  0xd6   : > { %v538_v3 = vsel %vm536_vm1, %v537_v2, 0  ;;  %1815 = vmatpush3.bf16.msra.mxu1 %v1985_v8  ;;  %v1989_v13 = vld [vmem:[%s2725_s5] sm:$0xff]   ;;  %v1990_v14 = vld [vmem:[%s2725_s5 + $0x8] sm:$0xff]   ;;  %v1701_v15 = vld [vmem:[#allocation6] ss:$0 sm:$0xff]  ;;  %s489_s30 = sand.u32 1, %s2271_s18  }
  0xd7   : > { %s1700_s13 = sshll.u32 %s493_s12, 2  ;;  %v540_v7 = vand.u32 %v538_v3, %v507_v5  ;;  %1816 = vmatprep.subr.bf16.mxu1 %v2300_v0  ;;  %v1991_v25 = vld [vmem:[%s2725_s5 + $0x10] sm:$0xff]   ;;  %v1992_v26 = vld [vmem:[%s2725_s5 + $0x18] sm:$0xff]   ;;  %v1994_v28 = vld [vmem:[#allocation12 + $0x8] sm:$0xff]   ;;  %s1699_s21 = sshll.u32 %s489_s30, 3 }
  0xd8   : > { %s498_s15 = scalar_lea.vmem %s2720_s0, %s1700_s13  ;;  %v1993_v27 = vld [vmem:[#allocation12] sm:$0xff]   ;;  %v1703_v29 = vld [vmem:[#allocation9] ss:$0 sm:$0xff]  ;;  %v1995_v39 = vld [vmem:[#allocation12 + $0x10] sm:$0xff]   ;;  %s1790_s13 = sshll.u32 %s2279_s20, 7 }
  0xd9   : > { %v505_v4 = vld [vmem:[%s498_s15] sm:$0x7]  ;;  %1809 = vmatpush3.bf16.msra.mxu0 %v540_v7  ;;  %v1996_v40 = vld [vmem:[#allocation12 + $0x18] sm:$0xff]   ;;  %v845_v41 = vld [vmem:[#allocation14] sm:$0xff]  ;;  %s491_s26 = scalar_lea.vmem [#allocation15], %s1699_s21  ;;  %s2673_s23 = scalar_lea.hbm %s2731_s11, %s1790_s13 }
  0xda   : > { %v506_v6 = vpack.c.bf16 %v505_v4, %v505_v4  ;;  %1826 = vmatprep.subr.bf16.mxu0 %v2300_v0  ;;  %1817 = vmatpush3.bf16.msra.mxu1 %v1986_v9  ;;  %v849_v42 = vld [vmem:[#allocation14 + $0x20] sm:$0xff]  ;;  %v846_v43 = vld [vmem:[#allocation14 + $0x8] sm:$0xff]  ;;  %v1709_v5 = vld [vmem:[#allocation11] ss:$0 sm:$0xff]  ;;  %s1541_s14 = sshll.u32 %s491_s26, 4  ;;  %s1527_s17 = scalar_lea.sflag [#allocation5], %s489_s30  ;;  %s2675_s14 = int_to_ptr.vmem [resolvable:$true] %s1541_s14 }
  0xdb   : > { %1818 = vmatprep.subr.bf16.mxu1 %v2300_v0  ;;  %v1721_v44 = vcombine.low %v845_v41, %v849_v42  ;;  %v1722_v45 = vcombine.high %v845_v41, %v849_v42  ;;  %v850_v46 = vld [vmem:[#allocation14 + $0x28] sm:$0xff]  ;;  %v853_v47 = vld [vmem:[#allocation14 + $0x40] sm:$0xff]  ;;  %s2193_s24 = scalar_lea.vmem %s2675_s14, 128  ;;  %p2762_p4 = scmp.ne.s32.totalorder %s2750_s27, 0 }
  0xdc   : > { %515 = vxpose.xlu0.c.b16.start.end [1/1] (short) (narrow) %v506_v6, 16  ;;  %v857_v48 = vld [vmem:[#allocation14 + $0x60] sm:$0xff]  ;;  %v1723_v49 = vcombine.low %v846_v43, %v850_v46  ;;  %v1724_v50 = vcombine.high %v846_v43, %v850_v46  ;;  %p2194_p2 = scmp.ne.s32.totalorder %s2675_s14, %s2193_s24  ;;  %s2305_s20 = smov [#allocation15]  }
  0xdd   : > { %v1730_v51 = vcombine.high %v853_v47, %v857_v48  ;;  %v1729_v52 = vcombine.low %v853_v47, %v857_v48  ;;  %v861_v53 = vld [vmem:[#allocation14 + $0x80] sm:$0xff]  ;;  %v906_v47 = vld [vmem:[#allocation14 + $0x1e8] sm:$0xff]  ;;  %s2197_s2 = sshll.u32 %s2305_s20, 4  ;;  %s2198_s2 = int_to_ptr.vmem [resolvable:$false] %s2197_s2 }
  0xde   : > { %1819 = vmatpush3.bf16.msra.mxu1 %v1987_v11  ;;  %v865_v54 = vld [vmem:[#allocation14 + $0xa0] sm:$0xff]  ;;  %p2195_p8 = pnand %p2194_p2, %p2762_p4  ;;  %s2199_s19 = scalar_lea.vmem %s2198_s2, 256 }
  0xdf   : > { %1820 = vmatprep.subr.bf16.mxu1 %v2300_v0  ;;  %v1738_v55 = vcombine.high %v861_v53, %v865_v54  ;;  %v1737_v56 = vcombine.low %v861_v53, %v865_v54  ;;  %v869_v57 = vld [vmem:[#allocation14 + $0xc0] sm:$0xff]  ;;  %v848_v53 = vld [vmem:[#allocation14 + $0x18] sm:$0xff]  ;;  %p2200_p11 = scmp.lt.s32.totalorder %s2675_s14, %s2198_s2  ;;  %p2201_p3 = scmp.lt.s32.totalorder %s2199_s19, %s2193_s24 }
  0xe0   : > { %v873_v58 = vld [vmem:[#allocation14 + $0xe0] sm:$0xff]  ;;  %p2196_p10 = pneg %p2195_p8 }
  0xe1   : > { %v1746_v59 = vcombine.high %v869_v57, %v873_v58  ;;  %v1745_v60 = vcombine.low %v869_v57, %v873_v58  ;;  %v877_v61 = vld [vmem:[#allocation14 + $0x100] sm:$0xff]  ;;  %p2202_p5 = por %p2201_p3, %p2200_p11 }
  0xe2   : > { %1821 = vmatpush3.bf16.msra.mxu1 %v1988_v12  ;;  %v881_v62 = vld [vmem:[#allocation14 + $0x120] sm:$0xff]  ;;  %v854_v12 = vld [vmem:[#allocation14 + $0x48] sm:$0xff] }
  0xe3   : > { %1838 = vmatprep.subr.bf16.mxu1 %v2300_v0  ;;  %v1754_v63 = vcombine.high %v877_v61, %v881_v62  ;;  %v885_v1 = vld [vmem:[#allocation14 + $0x140] sm:$0xff]  ;;  %p2203_p6 = pnand %p2202_p5, %p2196_p10 }
  0xe4   : > { %v889_v2 = vld [vmem:[#allocation14 + $0x160] sm:$0xff] }
  0xe5   : > { %v1762_v3 = vcombine.high %v885_v1, %v889_v2  ;;  %v1761_v4 = vcombine.low %v885_v1, %v889_v2  ;;  %v901_v43 = vld [vmem:[#allocation14 + $0x1c0] sm:$0xff] }
 0x142   : > { %v523_v10 = vpop.trf.xlu0 }
 0x143   : > { %1811 = vmatmul.mubr.msk.bf16.vlgmr.msra.gmra.mrb[0].mxu0 %vm531_vm3, %v523_v10 }
 0x144   : > { %1834 = vmatprep.mubr.msk.bf16.mxu0 %vm2302_vm2, %v2300_v0  ;;  %1827 = vmatpush3.bf16.msra.mxu0 %v1989_v13  ;;  %v858_v13 = vld [vmem:[#allocation14 + $0x68] sm:$0xff] }
 0x145   : > { %1828 = vmatprep.subr.bf16.mxu0 %v2300_v0 }
 0x148   : > { %1829 = vmatpush3.bf16.msra.mxu0 %v1990_v14 }
 0x149   : > { %1830 = vmatprep.subr.bf16.mxu0 %v2300_v0 }
 0x14c   : > { %1831 = vmatpush3.bf16.msra.mxu0 %v1991_v25 }
 0x14d   : > { %1832 = vmatprep.subr.bf16.mxu0 %v2300_v0 }
 0x150   : > { %1833 = vmatpush3.bf16.msra.mxu0 %v1992_v26  ;;  %v878_v26 = vld [vmem:[#allocation14 + $0x108] sm:$0xff] }
 0x151   : > { %1229 = vmatprep.subr.bf16.mxu0 %v1722_v45  ;;  %v902_v45 = vld [vmem:[#allocation14 + $0x1c8] sm:$0xff] }
 0x216   : > { %v576_v16 = vpop.f32.mrb[0].mxu0 }
 0x217   : > { %v577_v17 = vadd.f32 %v1701_v15, %v576_v16  ;;  %v1812_v18 = vpop.f32.mrb[1].mxu0 }
 0x218   : > { %v579_v19 = vpop.f32.mrb[2].mxu0  ;;  %v862_v18 = vld [vmem:[#allocation14 + $0x88] sm:$0xff] }
 0x219   : > { %v580_v20 = vadd.f32 %v1701_v15, %v579_v19  ;;  %v1813_v21 = vpop.f32.mrb[3].mxu0  ;;  %v583_v22 = vmax.f32 %v577_v17, 0.0  ;;  %v1732_v17 = vcombine.high %v854_v12, %v858_v13  ;;  %v866_v19 = vld [vmem:[#allocation14 + $0xa8] sm:$0xff] }
 0x21a   : > { %v1740_v21 = vcombine.high %v862_v18, %v866_v19 }
 0x21b   : > { %v584_v23 = vmax.f32 %v580_v20, 0.0  ;;  %v1731_v20 = vcombine.low %v854_v12, %v858_v13  ;;  %v863_v12 = vld [vmem:[#allocation14 + $0x90] sm:$0xff] }
 0x21c   : > { %v867_v13 = vld [vmem:[#allocation14 + $0xb0] sm:$0xff] }
 0x21d   : > { %v585_v24 = vpack.c.bf16 %v584_v23, %v583_v22  ;;  %v870_v22 = vld [vmem:[#allocation14 + $0xc8] sm:$0xff] }
 0x21e   : > { %v874_v23 = vld [vmem:[#allocation14 + $0xe8] sm:$0xff] }
 0x21f   : > { %1823 = vmatmul.mubr.msk.bf16.vlgmr.msra.gmra.mrb[0].mxu1 %vm625_vm4, %v585_v24  ;;  %v1739_v24 = vcombine.low %v862_v18, %v866_v19  ;;  %v1748_v25 = vcombine.high %v870_v22, %v874_v23  ;;  %v1742_v18 = vcombine.high %v863_v12, %v867_v13 }
 0x220   : > { %1846 = vmatprep.mubr.msk.bf16.mxu1 %vm2302_vm2, %v2300_v0  ;;  %1839 = vmatpush3.bf16.msra.mxu1 %v1993_v27  ;;  %v882_v27 = vld [vmem:[#allocation14 + $0x128] sm:$0xff] }
 0x221   : > { %1840 = vmatprep.subr.bf16.mxu1 %v2300_v0 }
 0x224   : > { %1841 = vmatpush3.bf16.msra.mxu1 %v1994_v28  ;;  %v1747_v28 = vcombine.low %v870_v22, %v874_v23  ;;  %v872_v22 = vld [vmem:[#allocation14 + $0xd8] sm:$0xff] }
 0x225   : > { %1842 = vmatprep.subr.bf16.mxu1 %v2300_v0  ;;  %v876_v23 = vld [vmem:[#allocation14 + $0xf8] sm:$0xff] }
 0x228   : > { %1843 = vmatpush3.bf16.msra.mxu1 %v1995_v39  ;;  %v898_v39 = vld [vmem:[#allocation14 + $0x1a8] sm:$0xff] }
 0x229   : > { %1844 = vmatprep.subr.bf16.mxu1 %v2300_v0  ;;  %v1753_v0 = vcombine.low %v877_v61, %v881_v62 }
 0x22c   : > { %1845 = vmatpush3.bf16.msra.mxu1 %v1996_v40 }
 0x22d   : > { %1272 = vmatprep.subr.bf16.mxu1 %v1724_v50  ;;  %v1780_v50 = vcombine.high %v902_v45, %v906_v47 }
 0x2f2   : > { %v663_v30 = vpop.f32.mrb[0].mxu1 }
 0x2f3   : > { %v664_v31 = vadd.f32 %v1703_v29, %v663_v30  ;;  %v1824_v32 = vpop.f32.mrb[1].mxu1  ;;  %v886_v30 = vld [vmem:[#allocation14 + $0x148] sm:$0xff] }
 0x2f4   : > { %v666_v33 = vpop.f32.mrb[2].mxu1  ;;  %v1755_v32 = vcombine.low %v878_v26, %v882_v27 }
 0x2f5   : > { %v667_v34 = vadd.f32 %v1703_v29, %v666_v33  ;;  %v1825_v35 = vpop.f32.mrb[3].mxu1  ;;  %v670_v36 = vmax.f32 %v664_v31, 0.0  ;;  %v1756_v29 = vcombine.high %v878_v26, %v882_v27  ;;  %v890_v31 = vld [vmem:[#allocation14 + $0x168] sm:$0xff]  ;;  %v1752_v27 = vcombine.high %v872_v22, %v876_v23 }
 0x2f6   : > { %v1764_v33 = vcombine.high %v886_v30, %v890_v31  ;;  %v893_v35 = vld [vmem:[#allocation14 + $0x180] sm:$0xff] }
 0x2f7   : > { %v671_v37 = vmax.f32 %v667_v34, 0.0  ;;  %v1763_v34 = vcombine.low %v886_v30, %v890_v31  ;;  %v880_v30 = vld [vmem:[#allocation14 + $0x118] sm:$0xff] }
 0x2f8   : > { %v884_v31 = vld [vmem:[#allocation14 + $0x138] sm:$0xff] }
 0x2f9   : > { %v672_v38 = vpack.c.bf16 %v671_v37, %v670_v36  ;;  %v897_v36 = vld [vmem:[#allocation14 + $0x1a0] sm:$0xff]  ;;  %v894_v37 = vld [vmem:[#allocation14 + $0x188] sm:$0xff] }
 0x2fa   : > { %v1769_v40 = vcombine.low %v893_v35, %v897_v36  ;;  %v1771_v41 = vcombine.low %v894_v37, %v898_v39  ;;  %v1772_v42 = vcombine.high %v894_v37, %v898_v39  ;;  %v891_v37 = vld [vmem:[#allocation14 + $0x170] sm:$0xff]  ;;  %v892_v39 = vld [vmem:[#allocation14 + $0x178] sm:$0xff] }
 0x2fb   : > { %1835 = vmatmul.mubr.msk.bf16.vlgmr.msra.gmra.mrb[4].mxu0 %vm625_vm4, %v672_v38  ;;  %v1770_v38 = vcombine.high %v893_v35, %v897_v36  ;;  %v1760_v35 = vcombine.high %v880_v30, %v884_v31  ;;  %v887_v36 = vld [vmem:[#allocation14 + $0x150] sm:$0xff] }
 0x2fc   : > { %1230 = vmatpush1.bf16.msra.mxu0 %v1721_v44  ;;  %v905_v44 = vld [vmem:[#allocation14 + $0x1e0] sm:$0xff] }
 0x2fd   : > { %1231 = vmatprep.subr.bf16.mxu0 %v1730_v51  ;;  %v1778_v46 = vcombine.high %v901_v43, %v905_v44  ;;  %v1777_v48 = vcombine.low %v901_v43, %v905_v44  ;;  %v847_v51 = vld [vmem:[#allocation14 + $0x10] sm:$0xff] }
 0x2fe   : > { %v895_v44 = vld [vmem:[#allocation14 + $0x190] sm:$0xff] }
 0x300   : > { %1232 = vmatpush1.bf16.msra.mxu0 %v1729_v52  ;;  %v851_v52 = vld [vmem:[#allocation14 + $0x30] sm:$0xff] }
 0x301   : > { %1233 = vmatprep.subr.bf16.mxu0 %v1738_v55  ;;  %v1726_v54 = vcombine.high %v847_v51, %v851_v52  ;;  %v852_v55 = vld [vmem:[#allocation14 + $0x38] sm:$0xff] }
 0x302   : > { %v1727_v57 = vcombine.low %v848_v53, %v852_v55  ;;  %v1728_v58 = vcombine.high %v848_v53, %v852_v55  ;;  %v907_v53 = vld [vmem:[#allocation14 + $0x1f0] sm:$0xff]  ;;  %v908_v55 = vld [vmem:[#allocation14 + $0x1f8] sm:$0xff] }
 0x304   : > { %1234 = vmatpush1.bf16.msra.mxu0 %v1737_v56  ;;  %v1725_v56 = vcombine.low %v847_v51, %v851_v52  ;;  %v903_v52 = vld [vmem:[#allocation14 + $0x1d0] sm:$0xff] }
 0x305   : > { %1235 = vmatprep.subr.bf16.mxu0 %v1746_v59  ;;  %v2303_v59 = vmov 0  }
 0x306   : > { %1261 = vmatprep.mubr.bf16.mxu0 %v2303_v59 }
 0x308   : > { %1236 = vmatpush1.bf16.msra.mxu0 %v1745_v60  ;;  %v1715_v60 = vld [vmem:[%s2728_s8] ss:$0 sm:$0xff] }
 0x309   : > { %1237 = vmatprep.subr.bf16.mxu0 %v1754_v63 }
 0x30c   : > { %1238 = vmatpush1.bf16.msra.mxu0 %v1753_v0 }
 0x30d   : > { %1239 = vmatprep.subr.bf16.mxu0 %v1762_v3  ;;  %v855_v3 = vld [vmem:[#allocation14 + $0x50] sm:$0xff] }
 0x310   : > { %1240 = vmatpush1.bf16.msra.mxu0 %v1761_v4  ;;  %v859_v4 = vld [vmem:[#allocation14 + $0x70] sm:$0xff] }
 0x311   : > { %1241 = vmatprep.subr.bf16.mxu0 %v1770_v38  ;;  %v888_v38 = vld [vmem:[#allocation14 + $0x158] sm:$0xff] }
 0x312   : > { %v1768_v43 = vcombine.high %v888_v38, %v892_v39 }
 0x314   : > { %1242 = vmatpush1.bf16.msra.mxu0 %v1769_v40 }
 0x315   : > { %1243 = vmatprep.subr.bf16.mxu0 %v1778_v46  ;;  %v896_v46 = vld [vmem:[#allocation14 + $0x198] sm:$0xff] }
 0x318   : > { %1244 = vmatpush1.bf16.msra.mxu0 %v1777_v48  ;;  %v1765_v48 = vcombine.low %v887_v36, %v891_v37 }
 0x319   : > { %1315 = vmatprep.subr.bf16.mxu0 %v1726_v54  ;;  %v904_v54 = vld [vmem:[#allocation14 + $0x1d8] sm:$0xff] }
 0x3ce   : > { %v749_v6 = vpop.f32.mrb[4].mxu0 }
 0x3cf   : > { %v750_v7 = vadd.f32 %v1709_v5, %v749_v6  ;;  %v1836_v8 = vpop.f32.mrb[5].mxu0  ;;  %v860_v6 = vld [vmem:[#allocation14 + $0x78] sm:$0xff] }
 0x3d0   : > { %v752_v9 = vpop.f32.mrb[6].mxu0 }
 0x3d1   : > { %v753_v10 = vadd.f32 %v1709_v5, %v752_v9  ;;  %v1837_v11 = vpop.f32.mrb[7].mxu0  ;;  %v756_v14 = vmax.f32 %v750_v7, 0.0  ;;  %v856_v5 = vld [vmem:[#allocation14 + $0x58] sm:$0xff] }
 0x3d2   : > { %v1736_v11 = vcombine.high %v856_v5, %v860_v6 }
 0x3d3   : > { %v757_v15 = vmax.f32 %v753_v10, 0.0  ;;  %v1734_v10 = vcombine.high %v855_v3, %v859_v4 }
 0x3d5   : > { %v758_v16 = vpack.c.bf16 %v757_v15, %v756_v14  ;;  %v864_v14 = vld [vmem:[#allocation14 + $0x98] sm:$0xff] }
 0x3d6   : > { %v868_v15 = vld [vmem:[#allocation14 + $0xb8] sm:$0xff] }
 0x3d7   : > { %1847 = vmatmul.mubr.msk.bf16.vlgmr.msra.gmra.mrb[4].mxu1 %vm625_vm4, %v758_v16  ;;  %v1733_v16 = vcombine.low %v855_v3, %v859_v4  ;;  %v1744_v19 = vcombine.high %v864_v14, %v868_v15 }
 0x3d8   : > { %1273 = vmatpush1.bf16.msra.mxu1 %v1723_v49  ;;  %v1779_v49 = vcombine.low %v902_v45, %v906_v47  ;;  %1304 = vmatprep.mubr.bf16.mxu1 %v2303_v59  ;;  %v899_v45 = vld [vmem:[#allocation14 + $0x1b0] sm:$0xff]  ;;  %v900_v47 = vld [vmem:[#allocation14 + $0x1b8] sm:$0xff] }
 0x3d9   : > { %1274 = vmatprep.subr.bf16.mxu1 %v1732_v17  ;;  %v1735_v17 = vcombine.low %v856_v5, %v860_v6  ;;  %v1776_v51 = vcombine.high %v896_v46, %v900_v47 }
 0x3dc   : > { %1275 = vmatpush1.bf16.msra.mxu1 %v1731_v20  ;;  %v871_v20 = vld [vmem:[#allocation14 + $0xd0] sm:$0xff] }
 0x3dd   : > { %1276 = vmatprep.subr.bf16.mxu1 %v1740_v21  ;;  %v875_v21 = vld [vmem:[#allocation14 + $0xf0] sm:$0xff] }
 0x3de   : > { %v1750_v26 = vcombine.high %v871_v20, %v875_v21 }
 0x3e0   : > { %1277 = vmatpush1.bf16.msra.mxu1 %v1739_v24  ;;  %v1741_v24 = vcombine.low %v863_v12, %v867_v13 }
 0x3e1   : > { %1278 = vmatprep.subr.bf16.mxu1 %v1748_v25  ;;  %v1743_v25 = vcombine.low %v864_v14, %v868_v15 }
 0x3e4   : > { %1279 = vmatpush1.bf16.msra.mxu1 %v1747_v28  ;;  %v879_v28 = vld [vmem:[#allocation14 + $0x110] sm:$0xff] }
 0x3e5   : > { %1280 = vmatprep.subr.bf16.mxu1 %v1756_v29  ;;  %v883_v29 = vld [vmem:[#allocation14 + $0x130] sm:$0xff] }
 0x3e6   : > { %v1757_v40 = vcombine.low %v879_v28, %v883_v29 }
 0x3e8   : > { %1281 = vmatpush1.bf16.msra.mxu1 %v1755_v32  ;;  %v1749_v32 = vcombine.low %v871_v20, %v875_v21 }
 0x3e9   : > { %1282 = vmatprep.subr.bf16.mxu1 %v1764_v33  ;;  %v1751_v33 = vcombine.low %v872_v22, %v876_v23 }
 0x3ec   : > { %1283 = vmatpush1.bf16.msra.mxu1 %v1763_v34  ;;  %v1758_v34 = vcombine.high %v879_v28, %v883_v29 }
 0x3ed   : > { %1284 = vmatprep.subr.bf16.mxu1 %v1772_v42  ;;  %v1766_v42 = vcombine.high %v887_v36, %v891_v37 }
 0x3f0   : > { %1285 = vmatpush1.bf16.msra.mxu1 %v1771_v41  ;;  %v1759_v41 = vcombine.low %v880_v30, %v884_v31 }
 0x3f1   : > { %1286 = vmatprep.subr.bf16.mxu1 %v1780_v50  ;;  %v1774_v50 = vcombine.high %v895_v44, %v899_v45 }
 0x3f4   : > { %1287 = vmatpush1.bf16.msra.mxu1 %v1779_v49  ;;  %v1767_v49 = vcombine.low %v888_v38, %v892_v39 }
 0x3f5   : > { %1358 = vmatprep.subr.bf16.mxu1 %v1728_v58  ;;  %v1782_v58 = vcombine.high %v903_v52, %v907_v53 }
 0x4aa   : > { %v835_v61 = vpop.f32.mrb[4].mxu1 }
 0x4ab   : > { %v836_v62 = vadd.f32 %v1715_v60, %v835_v61  ;;  %v1848_v63 = vpop.f32.mrb[5].mxu1  ;;  %v1783_v61 = vcombine.low %v904_v54, %v908_v55 }
 0x4ac   : > { %v838_v0 = vpop.f32.mrb[6].mxu1 }
 0x4ad   : > { %v839_v1 = vadd.f32 %v1715_v60, %v838_v0  ;;  %v1849_v2 = vpop.f32.mrb[7].mxu1  ;;  %v842_v7 = vmax.f32 %v836_v62, 0.0  ;;  %v1781_v60 = vcombine.low %v903_v52, %v907_v53 }
 0x4af   : > { %v843_v8 = vmax.f32 %v839_v1, 0.0 }
 0x4b1   : > { %v2659_v9 = vpack.c.bf16 %v843_v8, %v842_v7 }
 0x4b3   : > { %1262 = vmatmul.mubr.bf16.vlgmr.msra.gmra.mrb[8].mxu0 %v2659_v9  ;;  %1305 = vmatmul.mubr.bf16.vlgmr.msra.gmra.mrb[8].mxu1 %v2659_v9 }
 0x4b4   : > { %1316 = vmatpush1.bf16.msra.mxu0 %v1725_v56  ;;  %1359 = vmatpush1.bf16.msra.mxu1 %v1727_v57  ;;  %v1773_v56 = vcombine.low %v895_v44, %v899_v45  ;;  %v1775_v57 = vcombine.low %v896_v46, %v900_v47 }
 0x4b5   : > { %1317 = vmatprep.subr.bf16.mxu0 %v1734_v10  ;;  %1360 = vmatprep.subr.bf16.mxu1 %v1736_v11 }
 0x4b6   : > { %1347 = vmatprep.mubr.bf16.mxu0 %v2303_v59  ;;  %1390 = vmatprep.mubr.bf16.mxu1 %v2303_v59  ;;  %v1784_v59 = vcombine.high %v904_v54, %v908_v55 }
 0x4b8   : > { %1318 = vmatpush1.bf16.msra.mxu0 %v1733_v16  ;;  %1361 = vmatpush1.bf16.msra.mxu1 %v1735_v17 }
 0x4b9   : > { %1319 = vmatprep.subr.bf16.mxu0 %v1742_v18  ;;  %1362 = vmatprep.subr.bf16.mxu1 %v1744_v19  ;;  %v1473_v19 = vlaneseq }
 0x4bb   : > { %v1474_v29 = vshrl.u32 %v1473_v19, 7 }
 0x4bc   : > { %1320 = vmatpush1.bf16.msra.mxu0 %v1741_v24  ;;  %1363 = vmatpush1.bf16.msra.mxu1 %v1743_v25 }
 0x4bd   : > { %1321 = vmatprep.subr.bf16.mxu0 %v1750_v26  ;;  %1364 = vmatprep.subr.bf16.mxu1 %v1752_v27 }
 0x4c0   : > { %1322 = vmatpush1.bf16.msra.mxu0 %v1749_v32  ;;  %1365 = vmatpush1.bf16.msra.mxu1 %v1751_v33 }
 0x4c1   : > { %1323 = vmatprep.subr.bf16.mxu0 %v1758_v34  ;;  %1366 = vmatprep.subr.bf16.mxu1 %v1760_v35 }
 0x4c4   : > { %1324 = vmatpush1.bf16.msra.mxu0 %v1757_v40  ;;  %1367 = vmatpush1.bf16.msra.mxu1 %v1759_v41 }
 0x4c5   : > { %1325 = vmatprep.subr.bf16.mxu0 %v1766_v42  ;;  %1368 = vmatprep.subr.bf16.mxu1 %v1768_v43 }
 0x4c8   : > { %1326 = vmatpush1.bf16.msra.mxu0 %v1765_v48  ;;  %1369 = vmatpush1.bf16.msra.mxu1 %v1767_v49 }
 0x4c9   : > { %1327 = vmatprep.subr.bf16.mxu0 %v1774_v50  ;;  %1370 = vmatprep.subr.bf16.mxu1 %v1776_v51 }
 0x4cc   : > { %1328 = vmatpush1.bf16.msra.mxu0 %v1773_v56  ;;  %1371 = vmatpush1.bf16.msra.mxu1 %v1775_v57 }
 0x4cd   : > { %1329 = vmatprep.subr.bf16.mxu0 %v1782_v58  ;;  %1372 = vmatprep.subr.bf16.mxu1 %v1784_v59 }
 0x4d0   : > { %1330 = vmatpush1.bf16.msra.mxu0 %v1781_v60  ;;  %1373 = vmatpush1.bf16.msra.mxu1 %v1783_v61 }
 0x4d3   : > { %1348 = vmatmul.mubr.bf16.vlgmr.msra.gmra.mrb[12].mxu0 %v2659_v9  ;;  %1391 = vmatmul.mubr.bf16.vlgmr.msra.gmra.mrb[12].mxu1 %v2659_v9  ;;  %v2304_v9 = vmov 1966171168  }
 0x4d4   : > { %v1471_v18 = vunpack.c.l.s4 %v2304_v9 }
 0x4d6   : > { %v1472_v28 = vunpack.c.0.s8 %v1471_v18 }
 0x4d8   : > { %v1475_v38 = vsub.s32 %v1472_v28, %v1474_v29 }
 0x586   : > { %v1263_v62 = vpop.f32.mrb[8].mxu0  ;;  %v1306_v63 = vpop.f32.mrb[8].mxu1 }
 0x587   : > { %v1265_v0 = vpop.f32.mrb[9].mxu0  ;;  %v1308_v1 = vpop.f32.mrb[9].mxu1 }
 0x588   : > { %v1267_v2 = vpop.f32.mrb[10].mxu0  ;;  %v1310_v3 = vpop.f32.mrb[10].mxu1 }
 0x589   : > { %v1402_v4 = vmax.f32 %v1263_v62, %v1267_v2  ;;  %v1416_v5 = vmax.f32 %v1306_v63, %v1310_v3  ;;  %v1269_v6 = vpop.f32.mrb[11].mxu0  ;;  %v1312_v7 = vpop.f32.mrb[11].mxu1 }
 0x58a   : > { %v1409_v8 = vmax.f32 %v1265_v0, %v1269_v6  ;;  %v1423_v10 = vmax.f32 %v1308_v1, %v1312_v7 }
 0x58b   : > { %v1403_v11 = vrot.slane %v1402_v4, 4  ;;  %v1417_v12 = vrot.slane %v1416_v5, 4 }
 0x58c   : > { %v1410_v13 = vrot.slane %v1409_v8, 4  ;;  %v1424_v14 = vrot.slane %v1423_v10, 4 }
 0x58d   : > { %v1404_v15 = vmax.f32 %v1402_v4, %v1403_v11  ;;  %v1418_v16 = vmax.f32 %v1416_v5, %v1417_v12 }
 0x58e   : > { %v1411_v17 = vmax.f32 %v1409_v8, %v1410_v13  ;;  %v1425_v20 = vmax.f32 %v1423_v10, %v1424_v14 }
 0x58f   : > { %v1405_v21 = vrot.slane %v1404_v15, 2  ;;  %v1419_v22 = vrot.slane %v1418_v16, 2 }
 0x590   : > { %v1412_v23 = vrot.slane %v1411_v17, 2  ;;  %v1426_v24 = vrot.slane %v1425_v20, 2 }
 0x591   : > { %v1406_v25 = vmax.f32 %v1404_v15, %v1405_v21  ;;  %v1420_v26 = vmax.f32 %v1418_v16, %v1419_v22 }
 0x592   : > { %v1413_v27 = vmax.f32 %v1411_v17, %v1412_v23  ;;  %v1427_v30 = vmax.f32 %v1425_v20, %v1426_v24  ;;  %v1522_v24 = vld [vmem:[%s2730_s10] sm:$0xff] }
 0x593   : > { %v1407_v31 = vrot.slane %v1406_v25, 1  ;;  %v1421_v32 = vrot.slane %v1420_v26, 1 }
 0x594   : > { %v1414_v33 = vrot.slane %v1413_v27, 1  ;;  %v1428_v34 = vrot.slane %v1427_v30, 1 }
 0x595   : > { %v1408_v35 = vmax.f32 %v1406_v25, %v1407_v31  ;;  %v1422_v36 = vmax.f32 %v1420_v26, %v1421_v32 }
 0x596   : > { %v1415_v37 = vmax.f32 %v1413_v27, %v1414_v33  ;;  %v1429_v39 = vmax.f32 %v1427_v30, %v1428_v34 }
 0x598   : > { %v1466_v40 = vcombine.low %v1408_v35, %v1415_v37  ;;  %v1467_v41 = vcombine.low %v1422_v36, %v1429_v39 }
 0x59a   : > { %v1476_v42 = vrot.slane %v1466_v40, %v1475_v38  ;;  %v1483_v43 = vrot.slane %v1467_v41, %v1475_v38 }
 0x59c   : > { %v1498_v44 = vcombine.low %v1476_v42, %v1483_v43 }
 0x59e   : > { %v1506_v22 = vrot.slane %v1498_v44, %v1475_v38 }
 0x5a6   : > { %v1349_v45 = vpop.f32.mrb[12].mxu0  ;;  %v1392_v46 = vpop.f32.mrb[12].mxu1 }
 0x5a7   : > { %v1351_v47 = vpop.f32.mrb[13].mxu0  ;;  %v1394_v48 = vpop.f32.mrb[13].mxu1 }
 0x5a8   : > { %v1353_v49 = vpop.f32.mrb[14].mxu0  ;;  %v1396_v50 = vpop.f32.mrb[14].mxu1 }
 0x5a9   : > { %v1430_v51 = vmax.f32 %v1349_v45, %v1353_v49  ;;  %v1444_v52 = vmax.f32 %v1392_v46, %v1396_v50  ;;  %v1355_v53 = vpop.f32.mrb[15].mxu0  ;;  %v1398_v54 = vpop.f32.mrb[15].mxu1 }
 0x5aa   : > { %v1437_v55 = vmax.f32 %v1351_v47, %v1355_v53  ;;  %v1451_v56 = vmax.f32 %v1394_v48, %v1398_v54 }
 0x5ab   : > { %v1431_v57 = vrot.slane %v1430_v51, 4  ;;  %v1445_v58 = vrot.slane %v1444_v52, 4 }
 0x5ac   : > { %v1438_v59 = vrot.slane %v1437_v55, 4  ;;  %v1452_v60 = vrot.slane %v1451_v56, 4 }
 0x5ad   : > { %v1432_v61 = vmax.f32 %v1430_v51, %v1431_v57  ;;  %v1446_v62 = vmax.f32 %v1444_v52, %v1445_v58 }
 0x5ae   : > { %v1439_v63 = vmax.f32 %v1437_v55, %v1438_v59  ;;  %v1453_v0 = vmax.f32 %v1451_v56, %v1452_v60 }
 0x5af   : > { %v1433_v1 = vrot.slane %v1432_v61, 2  ;;  %v1447_v2 = vrot.slane %v1446_v62, 2 }
 0x5b0   : > { %v1440_v3 = vrot.slane %v1439_v63, 2  ;;  %v1454_v4 = vrot.slane %v1453_v0, 2 }
 0x5b1   : > { %v1434_v5 = vmax.f32 %v1432_v61, %v1433_v1  ;;  %v1448_v6 = vmax.f32 %v1446_v62, %v1447_v2 }
 0x5b2   : > { %v1441_v7 = vmax.f32 %v1439_v63, %v1440_v3  ;;  %v1455_v8 = vmax.f32 %v1453_v0, %v1454_v4 }
 0x5b3   : > { %v1435_v10 = vrot.slane %v1434_v5, 1  ;;  %v1449_v11 = vrot.slane %v1448_v6, 1 }
 0x5b4   : > { %v1442_v12 = vrot.slane %v1441_v7, 1  ;;  %v1456_v13 = vrot.slane %v1455_v8, 1 }
 0x5b5   : > { %v1436_v14 = vmax.f32 %v1434_v5, %v1435_v10  ;;  %v1450_v15 = vmax.f32 %v1448_v6, %v1449_v11 }
 0x5b6   : > { %v1443_v16 = vmax.f32 %v1441_v7, %v1442_v12  ;;  %v1457_v17 = vmax.f32 %v1455_v8, %v1456_v13 }
 0x5b8   : > { %v1468_v9 = vcombine.low %v1436_v14, %v1443_v16  ;;  %v1469_v18 = vcombine.low %v1450_v15, %v1457_v17 }
 0x5ba   : > { %v1490_v19 = vrot.slane %v1468_v9, %v1475_v38  ;;  %v1497_v20 = vrot.slane %v1469_v18, %v1475_v38 }
 0x5bc   : > { %v1499_v21 = vcombine.low %v1490_v19, %v1497_v20 }
 0x5be   : > { %v1513_v23 = vrot.slane %v1499_v21, %v1475_v38 }
 0x5c0   : > { %v1514_v25 = vcombine.low %v1506_v22, %v1513_v23 }
 0x5c2   : > { %v1523_v26 = vadd.f32 %v1522_v24, %v1514_v25 }
 0x5c4   : > { %v1524_v27 = vmax.f32 %v1523_v26, 0.0 }
 0x5c6   : > { %1525 = vst [vmem:[%s491_s26] sm:$0xff] %v1524_v27 }
 0x5c7   : > { %2206 = shalt.err (!%p2203_p6)
}
 0x5c8   : > { %s2207_s16 = scalar_lea.hbm %s2673_s23, 128  ;;  %s2211_s29 = scalar_lea.hbm %s2731_s11, 256 }
 0x5c9   : > { %p2208_p7 = scmp.ne.s32.totalorder %s2673_s23, %s2207_s16  ;;  %p2212_p0 = scmp.lt.u32.totalorder %s2673_s23, %s2731_s11 }
 0x5ca   : > { %p2213_p1 = scmp.lt.u32.totalorder %s2211_s29, %s2207_s16  ;;  %p2215_p2 = scmp.lt.u32.totalorder %s2207_s16, %s2673_s23 }
 0x5cb   : > { %p2209_p9 = pnand %p2208_p7, %p2762_p4 }
 0x5cc   : > { %p2214_p13 = por %p2213_p1, %p2212_p0 }
 0x5cd   : > { %p2210_p12 = pneg %p2209_p9 }
 0x5ce   : > { %p2216_p8 = por %p2215_p2, %p2214_p13 }
 0x5d0   : > { %p2217_p10 = pnand %p2216_p8, %p2210_p12 }
 0x5d2   : > { %2220 = shalt.err (!%p2217_p10)
}
 0x5d3   : > { %1878 = dma.vmem_to_hbm [thread:$0]  (%p2762_p4), %s2675_s14, 128, %s2673_s23, %s1527_s17  }
 0x5d4 PF: > { %s2763_s4 = sld [smem:[#allocation24_spill]]  ;;  %s2764_s12 = sld [smem:[#allocation21_spill]] }
 0x5d5   : > { %s2765_s13 = sld [smem:[#allocation26_spill]] }
 0x5da   : > { %p1920_p11 = scmp.ge.s32.totalorder %s2763_s4, 2  ;;  %s1553_s26 = sand.u32 1, %s2764_s12  }
 0x5db   : > { %p2766_p3 = scmp.ne.s32.totalorder %s2765_s13, 0  ;;  %s1554_s15 = scalar_lea.sflag [#allocation5], %s1553_s26 }
 0x5dd   : > { %p1903_p5 = pnand %p1920_p11, %p2766_p3 }
 0x5df   : > { %2262 = dma.done.wait (!%p1903_p5), %s1554_s15, 128  }
 0x5e0   : > { %2264 = vsyncadd (!%p1903_p5), %s1554_s15, 4294967168  ;;  %s28_s22 = sadd.s32 1, %s2763_s4   ;;  %s2767_s24 = sld [smem:[#allocation22_spill]] }
 0x5e1   : > { %p25_p6 = scmp.ge.s32.totalorder %s28_s22, 4   ;;  %s2768_s19 = sld [smem:[#allocation27_spill]] }
 0x5e2   : > { %s2769_s20 = sld [smem:[#allocation23_spill]]  ;;  %s2770_s21 = sld [smem:[#allocation25_spill]] }
 0x5e3   : > { %s2771_s17 = smov %s2271_s18  ;;  %27 = sbr.rel (!%p25_p6) target bundleno = 11 (0xb), region = 136 }
 0x5e6   : > { %s2772_s18 = smov %s2767_s24 }
 0x5ea   :  { %1559 = vsyncpa [#allocation4], 1 }
 0x5eb   :  { %1561 = vsyncpa [#allocation4 + $0x1], 1 }
 0x5ec   :  { %1562 = vsyncpa [#allocation7], 1 }
 0x5ed   :  { %1563 = vsyncpa [#allocation10], 1 }
 0x5ee   :  { %1564 = vsyncpa [#allocation13], 1 }
 0x5ef   :  { %1565 = vsyncpa [#allocation5], 1 }
 0x5f0   :  { %1567 = vsyncpa [#allocation5 + $0x1], 1 }

</bundles_post_ra>
